<compile_context>
chip_gen: v7x
topology: tpu7x:2x2x1
jax: 0.10.0
libtpu: 0.0.40
codegen_flags: <defaults>
</compile_context>

<pallas_src>
import jax
import jax.numpy as jnp
from jax.experimental import pallas as pl
from jax.experimental.pallas import tpu as pltpu


# --------------------------------------------------------------------------- #
# Chip / budget discovery
# --------------------------------------------------------------------------- #
def _chip_params():
    """Return (vmem_capacity_bytes, multi_tensorcore_chip)."""
    vmem_cap = 128 << 20
    try:
        get_info = getattr(pltpu, "get_tpu_info", None)
        if get_info is not None:
            cap = getattr(get_info(), "vmem_capacity_bytes", None)
            if cap:
                vmem_cap = int(cap)
    except Exception:
        pass
    # v7x: 64 MiB VMEM per TensorCore, 2 TensorCores per chip. v5e/v6e: 128 MiB, 1 TC.
    multi_core = vmem_cap <= (64 << 20)
    try:
        kind = jax.devices()[0].device_kind.lower()
        if "v7" in kind:
            multi_core = True
    except Exception:
        pass
    return vmem_cap, multi_core


# --------------------------------------------------------------------------- #
# Tile selection
# --------------------------------------------------------------------------- #
def _choose_tiles(B, S, D, itemsize, sub, target, hard_cap, multi_core):
    """Pick (tb, ts, td) blocks for a (B, S, D) mean-over-S reduction."""
    # ---- feature (lane) axis block: full D unless even a (sub, sub, D) sliver
    # would blow the per-buffer VMEM cap; then use a multiple of 128 ----------
    if sub * sub * D * itemsize <= hard_cap:
        td = D
    else:
        td = ((hard_cap // (sub * sub * itemsize)) // 128) * 128
        td = max(128, min(td, D))

    # ---- batch / set axis blocks --------------------------------------------
    slab = S * td * itemsize                       # one batch row, full set axis
    rows = target // max(1, slab)
    if rows >= min(B, sub):
        # Whole set axis in one block -> single-pass kernel, no accumulator.
        ts = S
        tb = min(B, rows)
        if tb < B:
            tb = (tb // sub) * sub                 # output sublane legality
        if multi_core and tb >= B and B >= 2 * sub:
            # v7x only: leave >= 2 batch blocks so both TensorCores get work.
            tb = max(sub, ((B // 2) // sub) * sub)
    else:
        # Set axis must be tiled; accumulate across s-blocks in f32 scratch.
        tb = B if B <= sub else sub
        ts = target // max(1, tb * td * itemsize)
        ts = max(sub, (ts // sub) * sub)
        if ts >= S:
            ts = S
    return tb, ts, td


# --------------------------------------------------------------------------- #
# Kernels
# --------------------------------------------------------------------------- #
def _single_pass_kernel(inv_n):
    """ts == S: one reduction step per output block, no scratch accumulator."""
    def kernel(x_ref, o_ref):
        x = x_ref[...].astype(jnp.float32)                      # (tb, S, td)
        o_ref[...] = (jnp.sum(x, axis=1) * inv_n).astype(o_ref.dtype)
    return kernel


def _tiled_kernel(s_total, ts, inv_n, needs_mask):
    """Set axis tiled across the last grid dim; f32 accumulator in VMEM."""
    def kernel(x_ref, o_ref, acc_ref):
        s_idx = pl.program_id(2)
        last = pl.num_programs(2) - 1

        @pl.when(s_idx == 0)
        def _():
            acc_ref[...] = jnp.zeros_like(acc_ref)

        x = x_ref[...].astype(jnp.float32)                      # (tb, ts, td)

        if needs_mask:
            # Only the last set-axis block can run past S; interior blocks are
            # a pure load + add (no iota / compare / select).
            @pl.when(s_idx != last)
            def _():
                acc_ref[...] += jnp.sum(x, axis=1)

            @pl.when(s_idx == last)
            def _():
                row = jax.lax.broadcasted_iota(jnp.int32, (1,) + x.shape[1:], 1)
                valid = (s_idx * ts + row) < s_total
                acc_ref[...] += jnp.sum(jnp.where(valid, x, 0.0), axis=1)
        else:
            acc_ref[...] += jnp.sum(x, axis=1)

        @pl.when(s_idx == last)
        def _():
            o_ref[...] = (acc_ref[...] * inv_n).astype(o_ref.dtype)
    return kernel


# --------------------------------------------------------------------------- #
# pallas_call driver on a (B, S, D) view
# --------------------------------------------------------------------------- #
def _avg_pool_3d(x, out_dtype, inv_n, block_rows, block_set, target_bytes):
    B, S, D = x.shape
    itemsize = jnp.dtype(x.dtype).itemsize
    sub = 8 * max(1, 4 // itemsize)                 # 8 for f32, 16 for bf16/f16

    vmem_cap, multi_core = _chip_params()
    hard_cap = max(4 << 20, vmem_cap // 3)          # per-input-buffer cap
    if target_bytes is None:
        target = min(16 << 20, hard_cap)
    else:
        target = max(1 << 20, min(int(target_bytes), hard_cap))

    tb, ts, td = _choose_tiles(B, S, D, itemsize, sub, target, hard_cap, multi_core)

    # Legalized expert overrides.
    if block_rows is not None:
        tb = max(1, min(B, int(block_rows)))
        if tb < B and tb % sub:
            tb = min(B, ((tb + sub - 1) // sub) * sub)
    if block_set is not None:
        ts = max(1, min(S, int(block_set)))
        if ts < S and ts % sub:
            ts = min(S, ((ts + sub - 1) // sub) * sub)

    nb, nd, ns = pl.cdiv(B, tb), pl.cdiv(D, td), pl.cdiv(S, ts)
    needs_mask = (S % ts) != 0

    out_itemsize = jnp.dtype(out_dtype).itemsize
    in_tile = tb * ts * td * itemsize
    out_tile = tb * td * out_itemsize
    acc_bytes = tb * td * 4 if ns > 1 else 0
    needed = 2 * in_tile + 2 * out_tile + acc_bytes + (4 << 20)   # 2x = double buffer
    vmem_limit = int(min(max(needed, 32 << 20), vmem_cap - (8 << 20)))

    out_shape = jax.ShapeDtypeStruct((B, D), out_dtype)

    if ns == 1:
        # Whole set axis per step: no accumulator, no init/finalize branches.
        return pl.pallas_call(
            _single_pass_kernel(inv_n),
            out_shape=out_shape,
            grid_spec=pltpu.PrefetchScalarGridSpec(
                num_scalar_prefetch=0,
                grid=(nb, nd),
                in_specs=[pl.BlockSpec((tb, S, td), lambda b, d: (b, 0, d))],
                out_specs=pl.BlockSpec((tb, td), lambda b, d: (b, d)),
            ),
            compiler_params=pltpu.CompilerParams(
                dimension_semantics=("parallel", "parallel"),
                vmem_limit_bytes=vmem_limit,
            ),
        )(x)

    # Set axis tiled: reduction axis last, f32 accumulator scratch.
    return pl.pallas_call(
        _tiled_kernel(S, ts, inv_n, needs_mask),
        out_shape=out_shape,
        grid_spec=pltpu.PrefetchScalarGridSpec(
            num_scalar_prefetch=0,
            grid=(nb, nd, ns),
            in_specs=[pl.BlockSpec((tb, ts, td), lambda b, d, s: (b, s, d))],
            out_specs=pl.BlockSpec((tb, td), lambda b, d, s: (b, d)),
            scratch_shapes=[pltpu.VMEM((tb, td), jnp.float32)],
        ),
        compiler_params=pltpu.CompilerParams(
            dimension_semantics=("parallel", "parallel", "arbitrary"),
            vmem_limit_bytes=vmem_limit,
        ),
    )(x)


# --------------------------------------------------------------------------- #
# Public wrapper: torch.mean(input, dim=1)
# --------------------------------------------------------------------------- #
def avg_pooling(x, *, block_rows=None, block_set=None, target_bytes=None):
    """Pallas equivalent of torch.mean(input, dim=1) for inputs of rank >= 2."""
    if x.ndim < 2:
        raise ValueError("avg_pooling expects an input of rank >= 2")
    orig_dtype = x.dtype
    B, S = x.shape[0], x.shape[1]
    rest = x.shape[2:]
    D = 1
    for r in rest:
        D *= r
    x3 = x.reshape(B, S, D)
    inv_n = 1.0 / float(S)

    # Small-D lane folding: make the last (lane) dim dense by moving g set
    # positions into it; the g partial sums are folded up outside the kernel.
    g = 1
    if 0 < D < 128:
        gmax = max(1, 128 // D)
        for cand in range(min(gmax, S), 0, -1):
            if S % cand == 0:
                g = cand
                break

    if g > 1:
        xk = x3.reshape(B, S // g, g * D)
        out_f32 = _avg_pool_3d(xk, jnp.float32, inv_n,
                               block_rows, block_set, target_bytes)
        out = out_f32.reshape(B, g, D).sum(axis=1).astype(orig_dtype)
    else:
        out = _avg_pool_3d(x3, orig_dtype, inv_n,
                           block_rows, block_set, target_bytes)
    return out.reshape((B,) + rest)


# --------------------------------------------------------------------------- #
# Self-test
# --------------------------------------------------------------------------- #
if __name__ == "__main__":
    key = jax.random.PRNGKey(0)
    k0, k1, k2, k3 = jax.random.split(key, 4)

    checks = [
        # DeepSets demo shape: batch=2, set=8, hidden=32 (small D -> lane fold).
        (jax.random.normal(k0, (2, 8, 32), dtype=jnp.float32), {}),
        # Larger batch, lane-dense D: multiple / partial batch blocks.
        (jax.random.normal(k1, (20, 24, 128), dtype=jnp.float32), {}),
        # bf16 with a forced, masked set-axis tiling (S % block_set != 0).
        (jax.random.normal(k2, (4, 20, 128), dtype=jnp.bfloat16),
         dict(block_set=16)),
        # Rank-4 input: trailing dims flattened, mean still over dim 1.
        (jax.random.normal(k3, (2, 6, 4, 8), dtype=jnp.float32), {}),
    ]

    for x, kwargs in checks:
        out = jax.block_until_ready(avg_pooling(x, **kwargs))
        ref = jnp.mean(x.astype(jnp.float32), axis=1).astype(x.dtype)
        assert out.shape == ref.shape, (out.shape, ref.shape)
        assert out.dtype == ref.dtype, (out.dtype, ref.dtype)
        tol = 1e-2 if x.dtype == jnp.bfloat16 else 1e-5
        assert jnp.allclose(out.astype(jnp.float32), ref.astype(jnp.float32),
                            atol=tol, rtol=tol), "mismatch vs reference"

    print("KERNEL_OK")
</pallas_src>

<mosaic_0001>
module attributes {stable_mosaic.version = 11 : i64} {
  func.func @kernel(%arg0: i32, %arg1: i32, %arg2: memref<2x2x128xf32, #tpu.memory_space<vmem>>, %arg3: memref<2x128xf32, #tpu.memory_space<vmem>>) attributes {dimension_semantics = [#tpu.dimension_semantics<parallel>, #tpu.dimension_semantics<parallel>], iteration_bounds = array<i64: 1, 1>, scalar_prefetch = 0 : i64, scratch_operands = 0 : i64, tpu.core_type = #tpu.core_type<tc>, window_params = [{transform_indices = @transform_0, window_bounds = array<i64: 2, 2, 128>}, {transform_indices = @transform_1, window_bounds = array<i64: 2, 128>}]} {
    %c0 = arith.constant 0 : index
    %c0_0 = arith.constant 0 : index
    %c0_1 = arith.constant 0 : index
    %0 = vector.load %arg2[%c0, %c0_0, %c0_1] : memref<2x2x128xf32, #tpu.memory_space<vmem>>, vector<2x2x128xf32>
    %cst = arith.constant dense<0.000000e+00> : vector<2x128xf32>
    %1 = vector.multi_reduction <add>, %0, %cst [1] : vector<2x2x128xf32> to vector<2x128xf32>
    %cst_2 = arith.constant 1.250000e-01 : f32
    %2 = vector.broadcast %cst_2 : f32 to vector<2x128xf32>
    %3 = arith.mulf %1, %2 : vector<2x128xf32>
    %c0_3 = arith.constant 0 : index
    %c0_4 = arith.constant 0 : index
    %4 = vector.load %arg3[%c0_3, %c0_4] : memref<2x128xf32, #tpu.memory_space<vmem>>, vector<2x128xf32>
    tpu.vector_store %arg3[%c0_3, %c0_4], %3 {strides = array<i32>} : memref<2x128xf32, #tpu.memory_space<vmem>>, vector<2x128xf32>,
    return
  }
  func.func @transform_0(%arg0: i32, %arg1: i32) -> (i32, i32, i32) {
    %c0_i32 = arith.constant 0 : i32
    %c0_i32_0 = arith.constant 0 : i32
    return %arg0, %c0_i32, %arg1 : i32, i32, i32
  }
  func.func @transform_1(%arg0: i32, %arg1: i32) -> (i32, i32) {
    %c0_i32 = arith.constant 0 : i32
    return %arg0, %arg1 : i32, i32
  }
}

</mosaic_0001>

<bundles_post_ra>
// kernel: tpu_custom_call.1
= control target key start
LH: loop header
LB: loop body
LE: loop exit
PB: predicated region body
PF: predicated region fallthrough
CT: control target
= control target key end

     0   :  { %6 = vsyncpa [#allocation3], 0  ;;  %s153_s0 = inlined_call_operand.hbm [shape: f32[2,2,128], index: 0, kind: input, shape index: {}]   ;;  %s154_s1 = inlined_call_operand.hbm [shape: f32[2,128], index: 1, kind: output, shape index: {}]  }
   0x1   :  { %7 = vsyncpa [#allocation4], 0  ;;  %s115_s6 = smov [#allocation2]   ;;  %s67_s10 = scalar_lea.hbm %s153_s0, 64 }
   0x2   :  { %s13_s7 = sshll.u32 %s115_s6, 4  ;;  %p68_p0 = scmp.ne.s32.totalorder %s153_s0, %s67_s10  ;;  %s14_s7 = int_to_ptr.vmem [resolvable:$true] %s13_s7 }
   0x3   :  { %p71_p1 = scmp.lt.u32.totalorder %s67_s10, %s153_s0 }
   0x5   :  { %p73_p2 = pnand %p71_p1, %p68_p0 }
   0x7   :  { %76 = shalt.err (!%p73_p2)
}
   0x8   :  { %s77_s15 = scalar_lea.vmem %s14_s7, 64  ;;  %p82_p4 = scmp.lt.s32.totalorder %s14_s7, %s14_s7 }
   0x9   :  { %p78_p3 = scmp.ne.s32.totalorder %s14_s7, %s77_s15  ;;  %p83_p5 = scmp.lt.s32.totalorder %s77_s15, %s77_s15 }
   0xb   :  { %p84_p6 = por %p83_p5, %p82_p4 }
   0xd   :  { %p85_p7 = pnand %p84_p6, %p78_p3 }
   0xf   :  { %88 = shalt.err (!%p85_p7)
}
  0x10   :  { %s116_s16 = smov 32   ;;  %s117_s17 = smov 2  }
  0x11   :  { %19 = dma.hbm_to_vmem [thread:$0]  %s153_s0, 64, %s14_s7, [#allocation3], %s116_s16, %s116_s16, %s117_s17  }
  0x12   :  { %111 = dma.done.wait [#allocation3], 64  }
  0x13   :  { %112 = vsyncadd [#allocation3], 4294967232  ;;  %vm25_vm0 = vcmask 1041408   ;;  %v23_v0 = vld [vmem:[#allocation2] sm:$0x3]  ;;  %s118_s0 = smov [#allocation5]  }
  0x14   :  { %v24_v1 = vld [vmem:[#allocation2 + $0x2] sm:$0x3]  ;;  %v26_v2 = vsel %vm25_vm0, %v23_v0, 0.0  ;;  %s54_s20 = sshll.u32 %s118_s0, 4  ;;  %vm44_vm1 = vcmask 1041409   ;;  %s55_s20 = int_to_ptr.vmem [resolvable:$true] %s54_s20 }
  0x15   :  { %v33_v3 = vsel %vm25_vm0, %v24_v1, 0.0  ;;  %v27_v4 = vrot.slane %v26_v2, 4  ;;  %s89_s21 = scalar_lea.vmem %s55_s20, 32  ;;  %p94_p9 = scmp.lt.s32.totalorder %s55_s20, %s55_s20 }
  0x16   :  { %v34_v5 = vrot.slane %v33_v3, 4  ;;  %p90_p8 = scmp.ne.s32.totalorder %s55_s20, %s89_s21  ;;  %p95_p10 = scmp.lt.s32.totalorder %s89_s21, %s89_s21 }
  0x17   :  { %v28_v6 = vadd.f32 %v27_v4, %v26_v2 }
  0x18   :  { %v35_v7 = vadd.f32 %v34_v5, %v33_v3  ;;  %p96_p11 = por %p95_p10, %p94_p9 }
  0x19   :  { %v29_v8 = vrot.slane %v28_v6, 2 }
  0x1a   :  { %v36_v9 = vrot.slane %v35_v7, 2  ;;  %p97_p12 = pnand %p96_p11, %p90_p8 }
  0x1b   :  { %v30_v10 = vadd.f32 %v29_v8, %v28_v6 }
  0x1c   :  { %v37_v11 = vadd.f32 %v36_v9, %v35_v7 }
  0x1d   :  { %v31_v12 = vrot.slane %v30_v10, 1 }
  0x1e   :  { %v38_v13 = vrot.slane %v37_v11, 1 }
  0x1f   :  { %v32_v14 = vadd.f32 %v31_v12, %v30_v10 }
  0x20   :  { %v39_v15 = vadd.f32 %v38_v13, %v37_v11 }
  0x21   :  { %v40_v16 = vmul.f32 0.125, %v32_v14 }
  0x22   :  { %v41_v17 = vmul.f32 0.125, %v39_v15 }
  0x24   :  { %v45_v18 = vsel %vm44_vm1, %v41_v17, %v40_v16 }
  0x25   :  { %47 = vst [vmem:[#allocation5] sm:$0x3] %v45_v18 }
  0x26   :  { %100 = shalt.err (!%p97_p12)
}
  0x27   :  { %s101_s24 = scalar_lea.hbm %s154_s1, 32 }
  0x28   :  { %p102_p13 = scmp.ne.s32.totalorder %s154_s1, %s101_s24  ;;  %p105_p0 = scmp.lt.u32.totalorder %s101_s24, %s154_s1 }
  0x2a   :  { %p107_p1 = pnand %p105_p0, %p102_p13 }
  0x2c   :  { %110 = shalt.err (!%p107_p1)
}
  0x2d   :  { %57 = dma.vmem_to_hbm [thread:$0]  %s55_s20, 32, %s154_s1, [#allocation4]  }
  0x2e   :  { %113 = dma.done.wait [#allocation4], 32  }
  0x2f   :  { %114 = vsyncadd [#allocation4], 4294967264 }
  0x30   :  { %61 = vsyncpa [#allocation3], 1 }
  0x31   :  { %62 = vsyncpa [#allocation4], 1 }

</bundles_post_ra>
